<compile_context>
chip_gen: v6e
topology: v6e:2x2x1
jax: 0.10.0
libtpu: 0.0.40
codegen_flags: <defaults>
</compile_context>

<pallas_src>
import math

import jax
import jax.numpy as jnp
from jax.experimental import pallas as pl
from jax.experimental.pallas import tpu as pltpu


def cls_token_kernel(x_ref, w_ref, o_ref):
    """x_ref: (bt, T, D), w_ref: (1, D), o_ref: (bt, T+1, D)."""
    bt, T, D = x_ref.shape
    cls = jnp.broadcast_to(
        w_ref[...].reshape(1, 1, D).astype(o_ref.dtype), (bt, 1, D)
    )
    # One lane/sublane-dense store for the whole tile (bulk tokens + CLS row).
    o_ref[...] = jnp.concatenate([x_ref[...].astype(o_ref.dtype), cls], axis=1)


def cls_token_forward(x, weight, *, target_block_bytes=1 << 20):
    """x: (B, T, D); weight: (D,) learned CLS token. Returns (B, T+1, D)."""
    B, T, D = x.shape
    out_dtype = x.dtype
    itemsize = jnp.dtype(out_dtype).itemsize

    # Batch tile sized so one output block is ~target_block_bytes (~1 MiB);
    # with default double buffering that is ~4 MiB of VMEM total — safe on
    # v5e (16 MiB scoped default), v6e (32 MiB) and v7x (32 MiB / 64 MiB phys).
    row_bytes = (T + 1) * D * itemsize
    bt = max(1, min(B, target_block_bytes // max(1, row_bytes)))
    grid = (pl.cdiv(B, bt),)

    w2d = weight.reshape(1, D)  # 2-D so it sits lane-dense in VMEM
    bytes_accessed = (B * T * D + D + B * (T + 1) * D) * itemsize

    return pl.pallas_call(
        cls_token_kernel,
        out_shape=jax.ShapeDtypeStruct((B, T + 1, D), out_dtype),
        grid=grid,
        in_specs=[
            pl.BlockSpec((bt, T, D), lambda i: (i, 0, 0)),
            pl.BlockSpec((1, D), lambda i: (0, 0)),
        ],
        out_specs=pl.BlockSpec((bt, T + 1, D), lambda i: (i, 0, 0)),
        compiler_params=pltpu.CompilerParams(
            dimension_semantics=("parallel",),
        ),
        cost_estimate=pl.CostEstimate(
            flops=0, transcendentals=0, bytes_accessed=bytes_accessed
        ),
    )(x, w2d)


if __name__ == "__main__":
    # Small shapes consistent with the module: batch=4, n_tokens=8, d_token=128.
    B, T, D = 4, 8, 128

    key = jax.random.PRNGKey(0)
    kx, kw = jax.random.split(key)
    x = jax.random.normal(kx, (B, T, D), jnp.float32)

    # _TokenInitialization.UNIFORM: U(-1/sqrt(d), 1/sqrt(d)) init of the CLS token.
    d_sqrt_inv = 1.0 / math.sqrt(D)
    weight = jax.random.uniform(kw, (D,), jnp.float32, -d_sqrt_inv, d_sqrt_inv)

    out = cls_token_forward(x, weight)
    out = jax.block_until_ready(out)

    # Reference: torch.cat([x, weight.expand(B, 1, D)], dim=1)
    ref = jnp.concatenate(
        [x, jnp.broadcast_to(weight.reshape(1, 1, D), (B, 1, D))], axis=1
    )
    assert out.shape == (B, T + 1, D) and out.dtype == jnp.float32
    assert jnp.allclose(out, ref)

    # Mixed-dtype robustness: bf16 activations with an f32 CLS parameter.
    x_bf16 = x.astype(jnp.bfloat16)
    out_bf16 = jax.block_until_ready(cls_token_forward(x_bf16, weight))
    ref_bf16 = jnp.concatenate(
        [x_bf16, jnp.broadcast_to(weight.reshape(1, 1, D), (B, 1, D)).astype(jnp.bfloat16)],
        axis=1,
    )
    assert out_bf16.shape == (B, T + 1, D) and out_bf16.dtype == jnp.bfloat16
    assert jnp.allclose(out_bf16.astype(jnp.float32), ref_bf16.astype(jnp.float32))

    print("KERNEL_OK")
</pallas_src>

<mosaic_0001>
module attributes {stable_mosaic.version = 11 : i64} {
  func.func @cls_token_kernel(%arg0: i32, %arg1: memref<4x8x128xf32, #tpu.memory_space<vmem>>, %arg2: memref<1x128xf32, #tpu.memory_space<vmem>>, %arg3: memref<4x9x128xf32, #tpu.memory_space<vmem>>) attributes {dimension_semantics = [#tpu.dimension_semantics<parallel>], iteration_bounds = array<i64: 1>, scalar_prefetch = 0 : i64, scratch_operands = 0 : i64, tpu.core_type = #tpu.core_type<tc>, window_params = [{transform_indices = @transform_0, window_bounds = array<i64: 4, 8, 128>}, {pipeline_mode = #tpu.pipeline_mode<synchronous>, transform_indices = @transform_1, window_bounds = array<i64: 1, 128>}, {transform_indices = @transform_2, window_bounds = array<i64: 4, 9, 128>}]} {
    %c0 = arith.constant 0 : index
    %c0_0 = arith.constant 0 : index
    %0 = vector.load %arg2[%c0, %c0_0] : memref<1x128xf32, #tpu.memory_space<vmem>>, vector<1x128xf32>
    %1 = vector.shape_cast %0 : vector<1x128xf32> to vector<1x1x128xf32>
    %2 = vector.shape_cast %1 : vector<1x1x128xf32> to vector<1x1x128xf32>
    %3 = vector.broadcast %2 : vector<1x1x128xf32> to vector<4x1x128xf32>
    %c0_1 = arith.constant 0 : index
    %c0_2 = arith.constant 0 : index
    %c0_3 = arith.constant 0 : index
    %4 = vector.load %arg1[%c0_1, %c0_2, %c0_3] : memref<4x8x128xf32, #tpu.memory_space<vmem>>, vector<4x8x128xf32>
    %5 = tpu.concatenate %4, %3 in 1 : vector<4x8x128xf32>, vector<4x1x128xf32> -> vector<4x9x128xf32>
    %c0_4 = arith.constant 0 : index
    %c0_5 = arith.constant 0 : index
    %c0_6 = arith.constant 0 : index
    %6 = vector.load %arg3[%c0_4, %c0_5, %c0_6] : memref<4x9x128xf32, #tpu.memory_space<vmem>>, vector<4x9x128xf32>
    tpu.vector_store %arg3[%c0_4, %c0_5, %c0_6], %5 {strides = array<i32>} : memref<4x9x128xf32, #tpu.memory_space<vmem>>, vector<4x9x128xf32>,
    return
  }
  func.func @transform_0(%arg0: i32) -> (i32, i32, i32) {
    %c0_i32 = arith.constant 0 : i32
    %c0_i32_0 = arith.constant 0 : i32
    %c0_i32_1 = arith.constant 0 : i32
    return %arg0, %c0_i32, %c0_i32_0 : i32, i32, i32
  }
  func.func @transform_1(%arg0: i32) -> (i32, i32) {
    %c0_i32 = arith.constant 0 : i32
    %c0_i32_0 = arith.constant 0 : i32
    %c0_i32_1 = arith.constant 0 : i32
    return %c0_i32, %c0_i32_0 : i32, i32
  }
  func.func @transform_2(%arg0: i32) -> (i32, i32, i32) {
    %c0_i32 = arith.constant 0 : i32
    %c0_i32_0 = arith.constant 0 : i32
    %c0_i32_1 = arith.constant 0 : i32
    return %arg0, %c0_i32, %c0_i32_0 : i32, i32, i32
  }
}

</mosaic_0001>

<bundles_post_ra>
// kernel: tpu_custom_call.1
= control target key start
LH: loop header
LB: loop body
LE: loop exit
PB: predicated region body
PF: predicated region fallthrough
CT: control target
= control target key end

     0   :  { %7 = vsyncpa [#allocation3], 0  ;;  %s68_s9 = smov [#allocation2]   ;;  %s116_s0 = inlined_call_operand.hbm [shape: f32[4,8,128], index: 0, kind: input, shape index: {}]   ;;  %s117_s1 = inlined_call_operand.vmem [shape: f32[1,128], index: 1, kind: input, shape index: {}]   ;;  %s118_s2 = inlined_call_operand.vmem [shape: f32[4,9,128], index: 2, kind: output, shape index: {}]  }
   0x1   :  { %s13_s10 = sshll.u32 %s68_s9, 4  ;;  %s14_s10 = int_to_ptr.vmem [resolvable:$true] %s13_s10 }
   0x2   :  { %s54_s11 = scalar_lea.vmem %s14_s10, 512  ;;  %p59_p1 = scmp.lt.s32.totalorder %s14_s10, %s14_s10 }
   0x3   :  { %p55_p0 = scmp.ne.s32.totalorder %s14_s10, %s54_s11  ;;  %p60_p2 = scmp.lt.s32.totalorder %s54_s11, %s54_s11 }
   0x5   :  { %p61_p3 = por %p60_p2, %p59_p1 }
   0x7   :  { %p62_p4 = pnand %p61_p3, %p55_p0 }
   0x9   :  { %65 = shalt.err (!%p62_p4)
}
   0xa   :  { %s69_s12 = smov 128   ;;  %s70_s13 = smov 8  }
   0xb   :  { %19 = dma.hbm_to_vmem [thread:$0]  %s116_s0, 512, %s14_s10, [#allocation3], %s69_s12, %s69_s12, %s70_s13  }
   0xc   :  { %66 = dma.done.wait [#allocation3], 512  }
   0xd   :  { %67 = vsyncadd [#allocation3], 4294966784  ;;  %v26_v0 = vld [vmem:[#allocation2] sm:$0xff]  ;;  %v27_v2 = vld [vmem:[#allocation2 + $0x8] sm:$0xff] }
   0xe   :  { %v25_v1 = vld [vmem:[%s117_s1] sm:$0x1]  ;;  %30 = vst [vmem:[%s118_s2] sm:$0xff] %v26_v0  ;;  %32 = vst [vmem:[%s118_s2 + $0x10] sm:$0xff] %v27_v2  ;;  %v28_v3 = vld [vmem:[#allocation2 + $0x10] sm:$0xff] }
   0xf   :  { %31 = vst [vmem:[%s118_s2 + $0x8] sm:$0x1] %v25_v1  ;;  %33 = vst [vmem:[%s118_s2 + $0x18] sm:$0x1] %v25_v1  ;;  %v29_v4 = vld [vmem:[#allocation2 + $0x18] sm:$0xff] }
  0x10   :  { %35 = vst [vmem:[%s118_s2 + $0x28] sm:$0x1] %v25_v1  ;;  %37 = vst [vmem:[%s118_s2 + $0x38] sm:$0x1] %v25_v1 }
  0x11   :  { %34 = vst [vmem:[%s118_s2 + $0x20] sm:$0xff] %v28_v3  ;;  %36 = vst [vmem:[%s118_s2 + $0x30] sm:$0xff] %v29_v4 }
  0x12   :  { %42 = vsyncpa [#allocation3], 1 }

</bundles_post_ra>
